<compile_context>
chip_gen: v7x
topology: tpu7x:2x2x1
jax: 0.10.0
libtpu: 0.0.40
codegen_flags: <defaults>
</compile_context>

<pallas_src>
import math

import jax
import jax.numpy as jnp
from jax.experimental import pallas as pl
from jax.experimental.pallas import tpu as pltpu


# ---------------------------------------------------------------------------
# Exact (erf-based) GELU, matching PyTorch F.gelu default (approximate='none').
# erf is built from mul/add/div/exp/select only (Abramowitz & Stegun 7.1.26,
# max abs err ~1.5e-7), so it is guaranteed to lower in Mosaic.
# ---------------------------------------------------------------------------
_A1, _A2, _A3, _A4, _A5 = (0.254829592, -0.284496736, 1.421413741,
                           -1.453152027, 1.061405429)
_P = 0.3275911
_INV_SQRT2 = 1.0 / math.sqrt(2.0)


def _erf(x):
    s = jnp.where(x >= 0.0, 1.0, -1.0)
    ax = x * s
    t = 1.0 / (1.0 + _P * ax)
    poly = ((((_A5 * t + _A4) * t + _A3) * t + _A2) * t + _A1) * t
    return s * (1.0 - poly * jnp.exp(-ax * ax))


def _gelu_exact(x):
    return 0.5 * x * (1.0 + _erf(x * _INV_SQRT2))


# ---------------------------------------------------------------------------
# Fused FFN kernel: out = gelu(x @ W1t + b1) @ W2t + b2
# Grid: (row tiles [parallel], dim_ffn tiles [arbitrary / reduction]).
# ---------------------------------------------------------------------------
def _ffn_kernel(x_ref, w1_ref, b1_ref, w2_ref, b2_ref, o_ref, acc_ref):
    j = pl.program_id(1)

    @pl.when(j == 0)
    def _():
        acc_ref[...] = jnp.zeros_like(acc_ref)

    # First "conv" (per-position linear) on this dim_ffn chunk, bias, GELU.
    h = jnp.dot(x_ref[...], w1_ref[...], preferred_element_type=jnp.float32)
    h = _gelu_exact(h + b1_ref[...])                         # (tm, tf)

    # Second "conv": partial contraction over this dim_ffn chunk.
    acc_ref[...] += jnp.dot(h, w2_ref[...], preferred_element_type=jnp.float32)

    @pl.when(j == pl.num_programs(1) - 1)
    def _():
        o_ref[...] = (acc_ref[...] + b2_ref[...]).astype(o_ref.dtype)


def _round_up(n, m):
    return ((n + m - 1) // m) * m


def feed_forward_network(x, w1, b1, w2, b2, *, row_tile=512, ffn_tile=512):
    """x: (B,S,H); w1: (F,H) (conv1 weight, k=1 squeezed); b1: (F,);
    w2: (H,F); b2: (H,). Returns (B,S,H)."""
    B, S, H = x.shape
    Fdim = w1.shape[0]

    # Lay out operands so both matmuls are plain row-major GEMMs.
    x2 = x.reshape(B * S, H)               # lane-dense rows (last dim = H)
    w1t = jnp.transpose(w1)                # (H, F)
    w2t = jnp.transpose(w2)                # (F, H)
    b1r = b1.reshape(1, Fdim)
    b2r = b2.reshape(1, H)

    M = B * S
    tm = min(row_tile, _round_up(M, 8))    # fat row tiles, sublane-aligned
    mp = _round_up(M, tm)
    if mp != M:
        x2 = jnp.pad(x2, ((0, mp - M), (0, 0)))   # extra rows discarded later

    tf = min(ffn_tile, _round_up(Fdim, 128))
    fp = _round_up(Fdim, tf)
    if fp != Fdim:
        # Zero-padding dim_ffn is exact: gelu(0) = 0 and 0-rows of W2t add nothing.
        w1t = jnp.pad(w1t, ((0, 0), (0, fp - Fdim)))
        b1r = jnp.pad(b1r, ((0, 0), (0, fp - Fdim)))
        w2t = jnp.pad(w2t, ((0, fp - Fdim), (0, 0)))

    grid = (mp // tm, fp // tf)

    # Rough VMEM footprint (double-buffered ins/outs + resident accumulator + h);
    # only raise the scoped limit when large tiles actually need it (v7x: 64 MiB).
    est = 4 * (2 * tm * H + 2 * H * tf + 2 * tf + 2 * tf * H + 2 * H
               + 2 * tm * H + tm * H + tm * tf)
    vmem_limit = min(est + (8 << 20), 64 << 20) if est > (24 << 20) else None

    out = pl.pallas_call(
        _ffn_kernel,
        out_shape=jax.ShapeDtypeStruct((mp, H), x.dtype),
        grid_spec=pltpu.PrefetchScalarGridSpec(
            num_scalar_prefetch=0,
            grid=grid,
            in_specs=[
                pl.BlockSpec((tm, H), lambda i, j: (i, 0)),    # x row tile
                pl.BlockSpec((H, tf), lambda i, j: (0, j)),    # W1^T ffn chunk
                pl.BlockSpec((1, tf), lambda i, j: (0, j)),    # b1 ffn chunk
                pl.BlockSpec((tf, H), lambda i, j: (j, 0)),    # W2^T ffn chunk
                pl.BlockSpec((1, H), lambda i, j: (0, 0)),     # b2 (resident)
            ],
            out_specs=pl.BlockSpec((tm, H), lambda i, j: (i, 0)),
            scratch_shapes=[pltpu.VMEM((tm, H), jnp.float32)],
        ),
        compiler_params=pltpu.CompilerParams(
            dimension_semantics=("parallel", "arbitrary"),
            vmem_limit_bytes=vmem_limit,
        ),
    )(x2, w1t, b1r, w2t, b2r)

    return out[:M].reshape(B, S, H)


# ---------------------------------------------------------------------------
# Pure-JAX reference (matches the PyTorch module: Conv1d(k=1) == per-token Linear)
# ---------------------------------------------------------------------------
def feed_forward_network_ref(x, w1, b1, w2, b2):
    h = jnp.einsum("bsh,fh->bsf", x, w1) + b1
    h = jax.nn.gelu(h, approximate=False)      # exact erf GELU == F.gelu default
    return jnp.einsum("bsf,hf->bsh", h, w2) + b2


if __name__ == "__main__":
    # Small, deterministic config. Hidden/ffn chosen lane-dense (multiples of 128).
    BATCH, SEQ = 2, 8
    DIM_HIDDEN, DIM_FFN = 128, 256

    key = jax.random.PRNGKey(0)
    kx, kw1, kb1, kw2, kb2 = jax.random.split(key, 5)

    x = jax.random.normal(kx, (BATCH, SEQ, DIM_HIDDEN), dtype=jnp.float32)

    # Conv1d(k=1)-style params (PyTorch-like uniform(-1/sqrt(fan_in), 1/sqrt(fan_in))).
    lim1 = 1.0 / math.sqrt(DIM_HIDDEN)
    w1 = jax.random.uniform(kw1, (DIM_FFN, DIM_HIDDEN), jnp.float32, -lim1, lim1)
    b1 = jax.random.uniform(kb1, (DIM_FFN,), jnp.float32, -lim1, lim1)
    lim2 = 1.0 / math.sqrt(DIM_FFN)
    w2 = jax.random.uniform(kw2, (DIM_HIDDEN, DIM_FFN), jnp.float32, -lim2, lim2)
    b2 = jax.random.uniform(kb2, (DIM_HIDDEN,), jnp.float32, -lim2, lim2)

    out = feed_forward_network(x, w1, b1, w2, b2)
    out = jax.block_until_ready(out)

    ref = feed_forward_network_ref(x, w1, b1, w2, b2)
    assert out.shape == x.shape and out.dtype == x.dtype
    max_err = float(jnp.max(jnp.abs(out - ref)))
    assert jnp.allclose(out, ref, atol=1e-4, rtol=1e-4), f"mismatch vs ref, max abs err={max_err}"

    print("KERNEL_OK")
</pallas_src>

<mosaic_0001>
module attributes {stable_mosaic.version = 11 : i64} {
  func.func @_ffn_kernel(%arg0: i32, %arg1: i32, %arg2: memref<16x128xf32, #tpu.memory_space<vmem>>, %arg3: memref<128x256xf32, #tpu.memory_space<vmem>>, %arg4: memref<1x256xf32, #tpu.memory_space<vmem>>, %arg5: memref<256x128xf32, #tpu.memory_space<vmem>>, %arg6: memref<1x128xf32, #tpu.memory_space<vmem>>, %arg7: memref<16x128xf32, #tpu.memory_space<vmem>>, %arg8: memref<16x128xf32, #tpu.memory_space<vmem>>) attributes {dimension_semantics = [#tpu.dimension_semantics<parallel>, #tpu.dimension_semantics<arbitrary>], iteration_bounds = array<i64: 1, 1>, scalar_prefetch = 0 : i64, scratch_operands = 1 : i64, tpu.core_type = #tpu.core_type<tc>, window_params = [{transform_indices = @transform_0, window_bounds = array<i64: 16, 128>}, {transform_indices = @transform_1, window_bounds = array<i64: 128, 256>}, {transform_indices = @transform_2, window_bounds = array<i64: 1, 256>}, {transform_indices = @transform_3, window_bounds = array<i64: 256, 128>}, {pipeline_mode = #tpu.pipeline_mode<synchronous>, transform_indices = @transform_4, window_bounds = array<i64: 1, 128>}, {transform_indices = @transform_5, window_bounds = array<i64: 16, 128>}]} {
    %c0_i32 = arith.constant 0 : i32
    %0 = arith.cmpi eq, %arg1, %c0_i32 : i32
    %1 = arith.extui %0 : i1 to i32
    %c0_i32_0 = arith.constant 0 : i32
    %2 = arith.cmpi ne, %1, %c0_i32_0 : i32
    scf.if %2 {
      %cst_31 = arith.constant 0.000000e+00 : f32
      %58 = vector.broadcast %cst_31 : f32 to vector<16x128xf32>
      %c0_32 = arith.constant 0 : index
      %c0_33 = arith.constant 0 : index
      %59 = vector.load %arg8[%c0_32, %c0_33] : memref<16x128xf32, #tpu.memory_space<vmem>>, vector<16x128xf32>
      tpu.vector_store %arg8[%c0_32, %c0_33], %58 {strides = array<i32>} : memref<16x128xf32, #tpu.memory_space<vmem>>, vector<16x128xf32>,
    } else {
    }
    %c0 = arith.constant 0 : index
    %c0_1 = arith.constant 0 : index
    %3 = vector.load %arg2[%c0, %c0_1] : memref<16x128xf32, #tpu.memory_space<vmem>>, vector<16x128xf32>
    %c0_2 = arith.constant 0 : index
    %c0_3 = arith.constant 0 : index
    %4 = vector.load %arg3[%c0_2, %c0_3] : memref<128x256xf32, #tpu.memory_space<vmem>>, vector<128x256xf32>
    %cst = arith.constant dense<0.000000e+00> : vector<16x256xf32>
    %5 = tpu.matmul %3, %4, %cst {dimension_numbers = #tpu.dot_dimension_numbers<[1], [0], [0], [1], [0, 0, 1, 1], [], []>} : vector<16x128xf32>, vector<128x256xf32>, vector<16x256xf32> -> vector<16x256xf32>
    %c0_4 = arith.constant 0 : index
    %c0_5 = arith.constant 0 : index
    %6 = vector.load %arg4[%c0_4, %c0_5] : memref<1x256xf32, #tpu.memory_space<vmem>>, vector<1x256xf32>
    %7 = vector.broadcast %6 : vector<1x256xf32> to vector<16x256xf32>
    %8 = arith.addf %5, %7 : vector<16x256xf32>
    %cst_6 = arith.constant 5.000000e-01 : f32
    %9 = vector.broadcast %cst_6 : f32 to vector<16x256xf32>
    %10 = arith.mulf %9, %8 : vector<16x256xf32>
    %cst_7 = arith.constant 0.707106769 : f32
    %11 = vector.broadcast %cst_7 : f32 to vector<16x256xf32>
    %12 = arith.mulf %8, %11 : vector<16x256xf32>
    %cst_8 = arith.constant 0.000000e+00 : f32
    %13 = vector.broadcast %cst_8 : f32 to vector<16x256xf32>
    %14 = arith.cmpf oge, %12, %13 : vector<16x256xf32>
    %cst_9 = arith.constant 1.000000e+00 : f32
    %cst_10 = arith.constant -1.000000e+00 : f32
    %15 = vector.broadcast %cst_9 : f32 to vector<16x256xf32>
    %16 = vector.broadcast %cst_10 : f32 to vector<16x256xf32>
    %17 = arith.select %14, %15, %16 : vector<16x256xi1>, vector<16x256xf32>
    %18 = arith.mulf %12, %17 : vector<16x256xf32>
    %cst_11 = arith.constant 0.327591091 : f32
    %19 = vector.broadcast %cst_11 : f32 to vector<16x256xf32>
    %20 = arith.mulf %19, %18 : vector<16x256xf32>
    %cst_12 = arith.constant 1.000000e+00 : f32
    %21 = vector.broadcast %cst_12 : f32 to vector<16x256xf32>
    %22 = arith.addf %21, %20 : vector<16x256xf32>
    %cst_13 = arith.constant 1.000000e+00 : f32
    %23 = vector.broadcast %cst_13 : f32 to vector<16x256xf32>
    %24 = arith.divf %23, %22 : vector<16x256xf32>
    %cst_14 = arith.constant 1.06140542 : f32
    %25 = vector.broadcast %cst_14 : f32 to vector<16x256xf32>
    %26 = arith.mulf %25, %24 : vector<16x256xf32>
    %cst_15 = arith.constant -1.45315206 : f32
    %27 = vector.broadcast %cst_15 : f32 to vector<16x256xf32>
    %28 = arith.addf %26, %27 : vector<16x256xf32>
    %29 = arith.mulf %28, %24 : vector<16x256xf32>
    %cst_16 = arith.constant 1.42141378 : f32
    %30 = vector.broadcast %cst_16 : f32 to vector<16x256xf32>
    %31 = arith.addf %29, %30 : vector<16x256xf32>
    %32 = arith.mulf %31, %24 : vector<16x256xf32>
    %cst_17 = arith.constant -0.284496725 : f32
    %33 = vector.broadcast %cst_17 : f32 to vector<16x256xf32>
    %34 = arith.addf %32, %33 : vector<16x256xf32>
    %35 = arith.mulf %34, %24 : vector<16x256xf32>
    %cst_18 = arith.constant 0.254829586 : f32
    %36 = vector.broadcast %cst_18 : f32 to vector<16x256xf32>
    %37 = arith.addf %35, %36 : vector<16x256xf32>
    %38 = arith.mulf %37, %24 : vector<16x256xf32>
    %cst_19 = arith.constant 0.000000e+00 : f32
    %39 = vector.broadcast %cst_19 : f32 to vector<16x256xf32>
    %40 = arith.subf %39, %18 : vector<16x256xf32>
    %41 = arith.mulf %40, %18 : vector<16x256xf32>
    %42 = math.exp %41 : vector<16x256xf32>
    %43 = arith.mulf %38, %42 : vector<16x256xf32>
    %cst_20 = arith.constant 1.000000e+00 : f32
    %44 = vector.broadcast %cst_20 : f32 to vector<16x256xf32>
    %45 = arith.subf %44, %43 : vector<16x256xf32>
    %46 = arith.mulf %17, %45 : vector<16x256xf32>
    %cst_21 = arith.constant 1.000000e+00 : f32
    %47 = vector.broadcast %cst_21 : f32 to vector<16x256xf32>
    %48 = arith.addf %47, %46 : vector<16x256xf32>
    %49 = arith.mulf %10, %48 : vector<16x256xf32>
    %c0_22 = arith.constant 0 : index
    %c0_23 = arith.constant 0 : index
    %50 = vector.load %arg8[%c0_22, %c0_23] : memref<16x128xf32, #tpu.memory_space<vmem>>, vector<16x128xf32>
    %c0_24 = arith.constant 0 : index
    %c0_25 = arith.constant 0 : index
    %51 = vector.load %arg5[%c0_24, %c0_25] : memref<256x128xf32, #tpu.memory_space<vmem>>, vector<256x128xf32>
    %cst_26 = arith.constant dense<0.000000e+00> : vector<16x128xf32>
    %52 = tpu.matmul %49, %51, %cst_26 {dimension_numbers = #tpu.dot_dimension_numbers<[1], [0], [0], [1], [0, 0, 1, 1], [], []>} : vector<16x256xf32>, vector<256x128xf32>, vector<16x128xf32> -> vector<16x128xf32>
    %53 = arith.addf %50, %52 : vector<16x128xf32>
    %c0_27 = arith.constant 0 : index
    %c0_28 = arith.constant 0 : index
    %54 = vector.load %arg8[%c0_27, %c0_28] : memref<16x128xf32, #tpu.memory_space<vmem>>, vector<16x128xf32>
    tpu.vector_store %arg8[%c0_27, %c0_28], %53 {strides = array<i32>} : memref<16x128xf32, #tpu.memory_space<vmem>>, vector<16x128xf32>,
    %c0_i32_29 = arith.constant 0 : i32
    %55 = arith.cmpi eq, %arg1, %c0_i32_29 : i32
    %56 = arith.extui %55 : i1 to i32
    %c0_i32_30 = arith.constant 0 : i32
    %57 = arith.cmpi ne, %56, %c0_i32_30 : i32
    scf.if %57 {
      %c0_31 = arith.constant 0 : index
      %c0_32 = arith.constant 0 : index
      %58 = vector.load %arg8[%c0_31, %c0_32] : memref<16x128xf32, #tpu.memory_space<vmem>>, vector<16x128xf32>
      %c0_33 = arith.constant 0 : index
      %c0_34 = arith.constant 0 : index
      %59 = vector.load %arg6[%c0_33, %c0_34] : memref<1x128xf32, #tpu.memory_space<vmem>>, vector<1x128xf32>
      %60 = vector.broadcast %59 : vector<1x128xf32> to vector<16x128xf32>
      %61 = arith.addf %58, %60 : vector<16x128xf32>
      %c0_35 = arith.constant 0 : index
      %c0_36 = arith.constant 0 : index
      %62 = vector.load %arg7[%c0_35, %c0_36] : memref<16x128xf32, #tpu.memory_space<vmem>>, vector<16x128xf32>
      tpu.vector_store %arg7[%c0_35, %c0_36], %61 {strides = array<i32>} : memref<16x128xf32, #tpu.memory_space<vmem>>, vector<16x128xf32>,
    } else {
    }
    return
  }
  func.func @transform_0(%arg0: i32, %arg1: i32) -> (i32, i32) {
    %c0_i32 = arith.constant 0 : i32
    %c0_i32_0 = arith.constant 0 : i32
    return %arg0, %c0_i32 : i32, i32
  }
  func.func @transform_1(%arg0: i32, %arg1: i32) -> (i32, i32) {
    %c0_i32 = arith.constant 0 : i32
    %c0_i32_0 = arith.constant 0 : i32
    return %c0_i32, %arg1 : i32, i32
  }
  func.func @transform_2(%arg0: i32, %arg1: i32) -> (i32, i32) {
    %c0_i32 = arith.constant 0 : i32
    %c0_i32_0 = arith.constant 0 : i32
    return %c0_i32, %arg1 : i32, i32
  }
  func.func @transform_3(%arg0: i32, %arg1: i32) -> (i32, i32) {
    %c0_i32 = arith.constant 0 : i32
    %c0_i32_0 = arith.constant 0 : i32
    return %arg1, %c0_i32 : i32, i32
  }
  func.func @transform_4(%arg0: i32, %arg1: i32) -> (i32, i32) {
    %c0_i32 = arith.constant 0 : i32
    %c0_i32_0 = arith.constant 0 : i32
    %c0_i32_1 = arith.constant 0 : i32
    return %c0_i32, %c0_i32_0 : i32, i32
  }
  func.func @transform_5(%arg0: i32, %arg1: i32) -> (i32, i32) {
    %c0_i32 = arith.constant 0 : i32
    %c0_i32_0 = arith.constant 0 : i32
    return %arg0, %c0_i32 : i32, i32
  }
}

</mosaic_0001>

<bundles_post_ra>
// kernel: tpu_custom_call.1
= control target key start
LH: loop header
LB: loop body
LE: loop exit
PB: predicated region body
PF: predicated region fallthrough
CT: control target
= control target key end

     0   :  { %10 = vsyncpa [#allocation4], 0  ;;  %s806_s0 = inlined_call_operand.hbm [shape: f32[16,128], index: 0, kind: input, shape index: {}]   ;;  %s807_s1 = inlined_call_operand.hbm [shape: f32[128,256], index: 1, kind: input, shape index: {}]   ;;  %s808_s2 = inlined_call_operand.vmem [shape: f32[1,256], index: 2, kind: input, shape index: {}]   ;;  %s809_s3 = inlined_call_operand.hbm [shape: f32[256,128], index: 3, kind: input, shape index: {}]   ;;  %s810_s4 = inlined_call_operand.vmem [shape: f32[1,128], index: 4, kind: input, shape index: {}]   ;;  %s811_s5 = inlined_call_operand.hbm [shape: f32[16,128], index: 5, kind: output, shape index: {}]  }
   0x1   :  { %11 = vsyncpa [#allocation7], 0 }
   0x2   :  { %12 = vsyncpa [#allocation5], 0  ;;  %s669_s18 = smov [#allocation6]   ;;  %s575_s22 = scalar_lea.hbm %s807_s1, 4096 }
   0x3   :  { %s30_s19 = sshll.u32 %s669_s18, 4  ;;  %p576_p0 = scmp.ne.s32.totalorder %s807_s1, %s575_s22  ;;  %s31_s19 = int_to_ptr.vmem [resolvable:$true] %s30_s19 }
   0x4   :  { %p579_p1 = scmp.lt.u32.totalorder %s575_s22, %s807_s1 }
   0x6   :  { %p581_p2 = pnand %p579_p1, %p576_p0 }
   0x8   :  { %584 = shalt.err (!%p581_p2)
}
   0x9   :  { %s585_s27 = scalar_lea.vmem %s31_s19, 4096  ;;  %p590_p4 = scmp.lt.s32.totalorder %s31_s19, %s31_s19 }
   0xa   :  { %p586_p3 = scmp.ne.s32.totalorder %s31_s19, %s585_s27  ;;  %p591_p5 = scmp.lt.s32.totalorder %s585_s27, %s585_s27 }
   0xc   :  { %p592_p6 = por %p591_p5, %p590_p4 }
   0xe   :  { %p593_p7 = pnand %p592_p6, %p586_p3 }
  0x10   :  { %596 = shalt.err (!%p593_p7)
}
  0x11   :  { %s670_s28 = smov 256   ;;  %s671_s29 = smov 16  }
  0x12   :  { %36 = dma.hbm_to_vmem [thread:$0]  %s807_s1, 4096, %s31_s19, [#allocation7], %s670_s28, %s670_s28, %s671_s29  }
  0x13   :  { %s672_s7 = smov [#allocation3]   ;;  %s597_s11 = scalar_lea.hbm %s806_s0, 256 }
  0x14   :  { %s18_s8 = sshll.u32 %s672_s7, 4  ;;  %p598_p8 = scmp.ne.s32.totalorder %s806_s0, %s597_s11  ;;  %s19_s8 = int_to_ptr.vmem [resolvable:$true] %s18_s8 }
  0x15   :  { %p601_p9 = scmp.lt.u32.totalorder %s597_s11, %s806_s0 }
  0x17   :  { %p603_p10 = pnand %p601_p9, %p598_p8 }
  0x19   :  { %606 = shalt.err (!%p603_p10)
}
  0x1a   :  { %s607_s16 = scalar_lea.vmem %s19_s8, 256  ;;  %p612_p12 = scmp.lt.s32.totalorder %s19_s8, %s19_s8 }
  0x1b   :  { %p608_p11 = scmp.ne.s32.totalorder %s19_s8, %s607_s16  ;;  %p613_p13 = scmp.lt.s32.totalorder %s607_s16, %s607_s16 }
  0x1d   :  { %p614_p0 = por %p613_p13, %p612_p12 }
  0x1f   :  { %p615_p1 = pnand %p614_p0, %p608_p11 }
  0x21   :  { %618 = shalt.err (!%p615_p1)
}
  0x22   :  { %s673_s1 = smov 128   ;;  %s674_s17 = smov 8  }
  0x23   :  { %24 = dma.hbm_to_vmem [thread:$0]  %s806_s0, 256, %s19_s8, [#allocation4], %s673_s1, %s673_s1, %s674_s17  }
  0x24   :  { %s675_s20 = smov [#allocation8]   ;;  %s619_s24 = scalar_lea.hbm %s809_s3, 4096 }
  0x25   :  { %s44_s21 = sshll.u32 %s675_s20, 4  ;;  %p620_p2 = scmp.ne.s32.totalorder %s809_s3, %s619_s24  ;;  %s45_s21 = int_to_ptr.vmem [resolvable:$true] %s44_s21 }
  0x26   :  { %p623_p3 = scmp.lt.u32.totalorder %s619_s24, %s809_s3 }
  0x28   :  { %p625_p4 = pnand %p623_p3, %p620_p2 }
  0x2a   :  { %628 = shalt.err (!%p625_p4)
}
  0x2b   :  { %s629_s29 = scalar_lea.vmem %s45_s21, 4096  ;;  %p634_p6 = scmp.lt.s32.totalorder %s45_s21, %s45_s21 }
  0x2c   :  { %p630_p5 = scmp.ne.s32.totalorder %s45_s21, %s629_s29  ;;  %p635_p7 = scmp.lt.s32.totalorder %s629_s29, %s629_s29 }
  0x2e   :  { %p636_p8 = por %p635_p7, %p634_p6 }
  0x30   :  { %p637_p9 = pnand %p636_p8, %p630_p5 }
  0x32   :  { %640 = shalt.err (!%p637_p9)
}
  0x33   :  { %50 = dma.hbm_to_vmem [thread:$0]  %s809_s3, 4096, %s45_s21, [#allocation7], %s673_s1, %s673_s1, %s674_s17  }
  0x34   :  { %663 = dma.done.wait [#allocation4], 256  }
  0x35   :  { %664 = vsyncadd [#allocation4], 4294967040 }
  0x36   :  { %665 = dma.done.wait [#allocation7], 8192  }
  0x37   :  { %666 = vsyncadd [#allocation7], 4294959104  ;;  %v676_v0 = vmov 0.0   ;;  %v71_v1 = vld [vmem:[#allocation6 + $0x8] sm:$0xff]  ;;  %v73_v2 = vld [vmem:[#allocation6 + $0x18] sm:$0xff]  ;;  %s678_s8 = smov [#allocation9]  }
  0x38   :  { %178 = vmatprep.mubr.f32.mxu0 %v676_v0  ;;  %v70_v3 = vld [vmem:[#allocation6] sm:$0xff]  ;;  %v485_v4 = vpack.c.bf16 %v73_v2, %v71_v1  ;;  %v72_v5 = vld [vmem:[#allocation6 + $0x10] sm:$0xff]  ;;  %v75_v6 = vld [vmem:[#allocation6 + $0x28] sm:$0xff]  ;;  %s433_s9 = sshll.u32 %s678_s8, 4  ;;  %s434_s9 = int_to_ptr.vmem [resolvable:$true] %s433_s9 }
  0x39   :  { %v77_v7 = vld [vmem:[#allocation6 + $0x38] sm:$0xff]  ;;  %v487_v8 = vpack.c.bf16 %v72_v5, %v70_v3  ;;  %v74_v10 = vld [vmem:[#allocation6 + $0x20] sm:$0xff]  ;;  %v76_v11 = vld [vmem:[#allocation6 + $0x30] sm:$0xff]  ;;  %s641_s10 = scalar_lea.vmem %s434_s9, 256  ;;  %p646_p11 = scmp.lt.s32.totalorder %s434_s9, %s434_s9 }
  0x3a   :  { %v489_v9 = vpack.c.bf16 %v77_v7, %v75_v6  ;;  %v79_v12 = vld [vmem:[#allocation6 + $0x48] sm:$0xff]  ;;  %486 = vmatprep.subr.bf16.mxu0 %v485_v4  ;;  %v81_v13 = vld [vmem:[#allocation6 + $0x58] sm:$0xff]  ;;  %v491_v14 = vpack.c.bf16 %v76_v11, %v74_v10  ;;  %v78_v16 = vld [vmem:[#allocation6 + $0x40] sm:$0xff]  ;;  %p642_p10 = scmp.ne.s32.totalorder %s434_s9, %s641_s10  ;;  %p647_p12 = scmp.lt.s32.totalorder %s641_s10, %s641_s10 }
  0x3b   :  { %488 = vmatpush1.bf16.msra.mxu0 %v487_v8  ;;  %v493_v15 = vpack.c.bf16 %v81_v13, %v79_v12  ;;  %v80_v17 = vld [vmem:[#allocation6 + $0x50] sm:$0xff]  ;;  %v83_v18 = vld [vmem:[#allocation6 + $0x68] sm:$0xff]  ;;  %v85_v19 = vld [vmem:[#allocation6 + $0x78] sm:$0xff] }
  0x3c   :  { %490 = vmatprep.subr.bf16.mxu0 %v489_v9  ;;  %v495_v20 = vpack.c.bf16 %v80_v17, %v78_v16  ;;  %v497_v21 = vpack.c.bf16 %v85_v19, %v83_v18  ;;  %v82_v22 = vld [vmem:[#allocation6 + $0x60] sm:$0xff]  ;;  %v84_v23 = vld [vmem:[#allocation6 + $0x70] sm:$0xff]  ;;  %v87_v24 = vld [vmem:[#allocation6 + $0x88] sm:$0xff]  ;;  %p648_p13 = por %p647_p12, %p646_p11 }
  0x3d   :  { %v89_v25 = vld [vmem:[#allocation6 + $0x98] sm:$0xff]  ;;  %v499_v26 = vpack.c.bf16 %v84_v23, %v82_v22  ;;  %v86_v28 = vld [vmem:[#allocation6 + $0x80] sm:$0xff]  ;;  %v88_v29 = vld [vmem:[#allocation6 + $0x90] sm:$0xff] }
  0x3e   :  { %v501_v27 = vpack.c.bf16 %v89_v25, %v87_v24  ;;  %v91_v30 = vld [vmem:[#allocation6 + $0xa8] sm:$0xff]  ;;  %v93_v31 = vld [vmem:[#allocation6 + $0xb8] sm:$0xff]  ;;  %v503_v32 = vpack.c.bf16 %v88_v29, %v86_v28  ;;  %v90_v34 = vld [vmem:[#allocation6 + $0xa0] sm:$0xff]  ;;  %p649_p0 = pnand %p648_p13, %p642_p10 }
  0x3f   :  { %492 = vmatpush1.bf16.msra.mxu0 %v491_v14  ;;  %v505_v33 = vpack.c.bf16 %v93_v31, %v91_v30  ;;  %v92_v35 = vld [vmem:[#allocation6 + $0xb0] sm:$0xff]  ;;  %v95_v36 = vld [vmem:[#allocation6 + $0xc8] sm:$0xff]  ;;  %v97_v37 = vld [vmem:[#allocation6 + $0xd8] sm:$0xff] }
  0x40   :  { %494 = vmatprep.subr.bf16.mxu0 %v493_v15  ;;  %v507_v38 = vpack.c.bf16 %v92_v35, %v90_v34  ;;  %v509_v39 = vpack.c.bf16 %v97_v37, %v95_v36  ;;  %v94_v40 = vld [vmem:[#allocation6 + $0xc0] sm:$0xff]  ;;  %v96_v41 = vld [vmem:[#allocation6 + $0xd0] sm:$0xff]  ;;  %v99_v42 = vld [vmem:[#allocation6 + $0xe8] sm:$0xff]  ;;  %v104_v35 = vlaneseq }
  0x41   :  { %v101_v43 = vld [vmem:[#allocation6 + $0xf8] sm:$0xff]  ;;  %v511_v44 = vpack.c.bf16 %v96_v41, %v94_v40  ;;  %v98_v46 = vld [vmem:[#allocation6 + $0xe0] sm:$0xff]  ;;  %v100_v47 = vld [vmem:[#allocation6 + $0xf0] sm:$0xff] }
  0x42   :  { %v513_v45 = vpack.c.bf16 %v101_v43, %v99_v42  ;;  %v515_v48 = vpack.c.bf16 %v100_v47, %v98_v46  ;;  %v68_v49 = vld [vmem:[#allocation3] sm:$0xff]  ;;  %v69_v50 = vld [vmem:[#allocation3 + $0x8] sm:$0xff]  ;;  %v317_v51 = vld [vmem:[#allocation8 + $0x80] sm:$0xff]  ;;  %v105_v36 = vshrl.u32 %v104_v35, 7 }
  0x43   :  { %496 = vmatpush1.bf16.msra.mxu0 %v495_v20  ;;  %v318_v52 = vld [vmem:[#allocation8 + $0x88] sm:$0xff]  ;;  %v301_v54 = vld [vmem:[#allocation8] sm:$0xff]  ;;  %v319_v56 = vld [vmem:[#allocation8 + $0x90] sm:$0xff] }
  0x44   :  { %498 = vmatprep.subr.bf16.mxu0 %v497_v21  ;;  %v517_v53 = vpack.c.bf16 %v318_v52, %v317_v51  ;;  %v302_v55 = vld [vmem:[#allocation8 + $0x8] sm:$0xff]  ;;  %v320_v58 = vld [vmem:[#allocation8 + $0x98] sm:$0xff]  ;;  %v303_v59 = vld [vmem:[#allocation8 + $0x10] sm:$0xff]  ;;  %v106_v37 = vsub.s32 0, %v105_v36  ;;  %v677_v51 = vmov -1.0  }
  0x45   :  { %v519_v57 = vpack.c.bf16 %v302_v55, %v301_v54  ;;  %v304_v60 = vld [vmem:[#allocation8 + $0x18] sm:$0xff]  ;;  %v521_v61 = vpack.c.bf16 %v320_v58, %v319_v56  ;;  %v321_v62 = vld [vmem:[#allocation8 + $0xa0] sm:$0xff]  ;;  %v322_v63 = vld [vmem:[#allocation8 + $0xa8] sm:$0xff] }
  0x46   :  { %518 = vmatprep.subr.bf16.mxu1 %v517_v53  ;;  %v523_v1 = vpack.c.bf16 %v304_v60, %v303_v59  ;;  %v305_v2 = vld [vmem:[#allocation8 + $0x20] sm:$0xff]  ;;  %v306_v3 = vld [vmem:[#allocation8 + $0x28] sm:$0xff]  ;;  %v323_v4 = vld [vmem:[#allocation8 + $0xb0] sm:$0xff] }
  0x47   :  { %500 = vmatpush1.bf16.msra.mxu0 %v499_v26  ;;  %520 = vmatpush3.bf16.msra.mxu1 %v519_v57  ;;  %v324_v5 = vld [vmem:[#allocation8 + $0xb8] sm:$0xff]  ;;  %v527_v6 = vpack.c.bf16 %v306_v3, %v305_v2  ;;  %v307_v8 = vld [vmem:[#allocation8 + $0x30] sm:$0xff]  ;;  %v325_v10 = vld [vmem:[#allocation8 + $0xc0] sm:$0xff] }
  0x48   :  { %502 = vmatprep.subr.bf16.mxu0 %v501_v27  ;;  %522 = vmatprep.subr.bf16.mxu1 %v521_v61  ;;  %v529_v7 = vpack.c.bf16 %v324_v5, %v323_v4  ;;  %v308_v9 = vld [vmem:[#allocation8 + $0x38] sm:$0xff]  ;;  %v326_v11 = vld [vmem:[#allocation8 + $0xc8] sm:$0xff]  ;;  %v309_v14 = vld [vmem:[#allocation8 + $0x40] sm:$0xff] }
  0x49   :  { %v531_v12 = vpack.c.bf16 %v308_v9, %v307_v8  ;;  %v533_v13 = vpack.c.bf16 %v326_v11, %v325_v10  ;;  %v310_v15 = vld [vmem:[#allocation8 + $0x48] sm:$0xff]  ;;  %v327_v16 = vld [vmem:[#allocation8 + $0xd0] sm:$0xff]  ;;  %v328_v17 = vld [vmem:[#allocation8 + $0xd8] sm:$0xff] }
  0x4a   :  { %v535_v18 = vpack.c.bf16 %v310_v15, %v309_v14  ;;  %v537_v19 = vpack.c.bf16 %v328_v17, %v327_v16  ;;  %v311_v20 = vld [vmem:[#allocation8 + $0x50] sm:$0xff]  ;;  %v312_v21 = vld [vmem:[#allocation8 + $0x58] sm:$0xff]  ;;  %v329_v22 = vld [vmem:[#allocation8 + $0xe0] sm:$0xff] }
  0x4b   :  { %504 = vmatpush1.bf16.msra.mxu0 %v503_v32  ;;  %524 = vmatpush3.bf16.msra.mxu1 %v523_v1  ;;  %v330_v23 = vld [vmem:[#allocation8 + $0xe8] sm:$0xff]  ;;  %v539_v24 = vpack.c.bf16 %v312_v21, %v311_v20  ;;  %v313_v26 = vld [vmem:[#allocation8 + $0x60] sm:$0xff]  ;;  %v331_v28 = vld [vmem:[#allocation8 + $0xf0] sm:$0xff] }
  0x4c   :  { %506 = vmatprep.subr.bf16.mxu0 %v505_v33  ;;  %v541_v25 = vpack.c.bf16 %v330_v23, %v329_v22  ;;  %v314_v27 = vld [vmem:[#allocation8 + $0x68] sm:$0xff]  ;;  %v332_v29 = vld [vmem:[#allocation8 + $0xf8] sm:$0xff]  ;;  %v315_v32 = vld [vmem:[#allocation8 + $0x70] sm:$0xff] }
  0x4d   :  { %v543_v30 = vpack.c.bf16 %v314_v27, %v313_v26  ;;  %v545_v31 = vpack.c.bf16 %v332_v29, %v331_v28  ;;  %v316_v33 = vld [vmem:[#allocation8 + $0x78] sm:$0xff] }
  0x4e   :  { %v547_v34 = vpack.c.bf16 %v316_v33, %v315_v32 }
  0x4f   :  { %508 = vmatpush1.bf16.msra.mxu0 %v507_v38  ;;  %v102_v38 = vld [vmem:[%s808_s2] sm:$0x3] }
  0x50   :  { %510 = vmatprep.subr.bf16.mxu0 %v509_v39  ;;  %v110_v39 = vsub.s32 1, %v105_v36  ;;  %v107_v40 = vrot.slane %v102_v38, %v106_v37 }
  0x52   :  { %v111_v41 = vrot.slane %v102_v38, %v110_v39 }
  0x53   :  { %512 = vmatpush1.bf16.msra.mxu0 %v511_v44 }
  0x54   :  { %514 = vmatprep.subr.bf16.mxu0 %v513_v45 }
  0x57   :  { %516 = vmatpush1.bf16.msra.mxu0 %v515_v48 }
  0x5a   :  { %179 = vmatmul.mubr.f32.vlgmr.msra.gmra.mrb[0].mxu0 %v68_v49 }
  0x5b   :  { %184 = vmatprep.mubr.f32.mxu0 %v676_v0  ;;  %v525_v0 = vpack.c.bf16 %v322_v63, %v321_v62 }
  0x5d   :  { %526 = vmatprep.subr.bf16.mxu1 %v525_v0 }
  0x5e   :  { %185 = vmatmul.mubr.f32.gmra.mrb[2].mxu0 %v69_v50  ;;  %528 = vmatpush3.bf16.msra.mxu1 %v527_v6 }
  0x5f   :  { %530 = vmatprep.subr.bf16.mxu1 %v529_v7 }
  0x62   :  { %532 = vmatpush3.bf16.msra.mxu1 %v531_v12 }
  0x63   :  { %534 = vmatprep.subr.bf16.mxu1 %v533_v13 }
  0x66   :  { %536 = vmatpush3.bf16.msra.mxu1 %v535_v18 }
  0x67   :  { %538 = vmatprep.subr.bf16.mxu1 %v537_v19 }
  0x6a   :  { %540 = vmatpush3.bf16.msra.mxu1 %v539_v24 }
  0x6b   :  { %542 = vmatprep.subr.bf16.mxu1 %v541_v25 }
  0x6e   :  { %544 = vmatpush3.bf16.msra.mxu1 %v543_v30 }
  0x6f   :  { %546 = vmatprep.subr.bf16.mxu1 %v545_v31 }
  0x72   :  { %548 = vmatpush3.bf16.msra.mxu1 %v547_v34 }
 0x12d   :  { %v180_v42 = vpop.f32.mrb[0].mxu0 }
 0x12e   :  { %v756_v43 = vadd.f32 %v180_v42, %v107_v40  ;;  %v182_v44 = vpop.f32.mrb[1].mxu0 }
 0x12f   :  { %v758_v45 = vadd.f32 %v182_v44, %v111_v41 }
 0x130   :  { %v195_v46 = vmul.f32 0.70710677, %v756_v43 }
 0x131   :  { %v196_v47 = vmul.f32 0.70710677, %v758_v45  ;;  %v186_v48 = vpop.f32.mrb[2].mxu0 }
 0x132   :  { %vm199_vm0 = vcmp.ge.f32.partialorder %v195_v46, 0.0  ;;  %v762_v49 = vadd.f32 %v186_v48, %v107_v40  ;;  %v188_v50 = vpop.f32.mrb[3].mxu0 }
 0x133   :  { %v764_v52 = vsel %vm199_vm0, 1.0, %v677_v51  ;;  %v766_v53 = vadd.f32 %v188_v50, %v111_v41  ;;  %vm200_vm1 = vcmp.ge.f32.partialorder %v196_v47, 0.0 }
 0x134   :  { %v207_v54 = vmul.f32 %v764_v52, %v195_v46  ;;  %v197_v55 = vmul.f32 0.70710677, %v762_v49  ;;  %v770_v56 = vsel %vm200_vm1, 1.0, %v677_v51 }
 0x135   :  { %v198_v57 = vmul.f32 0.70710677, %v766_v53  ;;  %v208_v58 = vmul.f32 %v770_v56, %v196_v47 }
 0x136   :  { %v211_v59 = vmul.f32 0.3275911, %v207_v54  ;;  %vm201_vm2 = vcmp.ge.f32.partialorder %v197_v55, 0.0  ;;  %v263_v7 = vsub.f32 0.0, %v207_v54 }
 0x137   :  { %v774_v60 = vsel %vm201_vm2, 1.0, %v677_v51  ;;  %vm202_vm3 = vcmp.ge.f32.partialorder %v198_v57, 0.0  ;;  %v212_v61 = vmul.f32 0.3275911, %v208_v58  ;;  %v264_v8 = vsub.f32 0.0, %v208_v58 }
 0x138   :  { %v215_v62 = vadd.f32 1.0, %v211_v59  ;;  %v209_v63 = vmul.f32 %v774_v60, %v197_v55  ;;  %v777_v1 = vsel %vm202_vm3, 1.0, %v677_v51  ;;  %v267_v10 = vmul.f32 %v263_v7, %v207_v54 }
 0x139   :  { %v210_v0 = vmul.f32 %v777_v1, %v198_v57  ;;  %v216_v2 = vadd.f32 1.0, %v212_v61  ;;  %v268_v14 = vmul.f32 %v264_v8, %v208_v58 }
 0x13a   :  { %559 = vrcp.f32 %v215_v62  ;;  %v213_v3 = vmul.f32 0.3275911, %v209_v63  ;;  %v265_v11 = vsub.f32 0.0, %v209_v63  ;;  %v271_v19 = vmul.f32 1.442695, %v267_v10 }
 0x13b   :  { %v214_v4 = vmul.f32 0.3275911, %v210_v0  ;;  %561 = vrcp.f32 %v216_v2  ;;  %v266_v13 = vsub.f32 0.0, %v210_v0  ;;  %v273_v24 = vmul.f32 1.442695, %v268_v14 }
 0x13c   :  { %v217_v5 = vadd.f32 1.0, %v213_v3  ;;  %v269_v20 = vmul.f32 %v265_v11, %v209_v63 }
 0x13d   :  { %v218_v6 = vadd.f32 1.0, %v214_v4  ;;  %v270_v23 = vmul.f32 %v266_v13, %v210_v0 }
 0x13e   :  { %563 = vrcp.f32 %v217_v5  ;;  %v275_v31 = vmul.f32 1.442695, %v269_v20 }
 0x13f   :  { %565 = vrcp.f32 %v218_v6  ;;  %v277_v34 = vmul.f32 1.442695, %v270_v23 }
 0x140   :  { %567 = vpow2.f32 %v271_v19 }
 0x141   :  { %569 = vpow2.f32 %v273_v24 }
 0x142   :  { %571 = vpow2.f32 %v275_v31 }
 0x143   :  { %573 = vpow2.f32 %v277_v34 }
 0x144   :  { %v560_v9 = vpop.eup %559 }
 0x145   :  { %v562_v12 = vpop.eup %561  ;;  %v227_v15 = vmul.f32 1.0614054, %v560_v9 }
 0x146   :  { %v228_v16 = vmul.f32 1.0614054, %v562_v12 }
 0x147   :  { %v231_v17 = vadd.f32 -1.4531521, %v227_v15 }
 0x148   :  { %v564_v18 = vpop.eup %563  ;;  %v232_v21 = vadd.f32 -1.4531521, %v228_v16 }
 0x149   :  { %v566_v22 = vpop.eup %565  ;;  %v235_v25 = vmul.f32 %v560_v9, %v231_v17  ;;  %v229_v26 = vmul.f32 1.0614054, %v564_v18  ;;  %v192_v17 = vmul.f32 0.5, %v758_v45 }
 0x14a   :  { %v236_v27 = vmul.f32 %v562_v12, %v232_v21  ;;  %v230_v28 = vmul.f32 1.0614054, %v566_v22  ;;  %v568_v59 = vpop.eup %567  ;;  %v191_v21 = vmul.f32 0.5, %v756_v43 }
 0x14b   :  { %v239_v29 = vadd.f32 1.4214138, %v235_v25  ;;  %v233_v30 = vadd.f32 -1.4531521, %v229_v26  ;;  %v570_v63 = vpop.eup %569  ;;  %v193_v26 = vmul.f32 0.5, %v762_v49 }
 0x14c   :  { %v240_v32 = vadd.f32 1.4214138, %v236_v27  ;;  %v234_v33 = vadd.f32 -1.4531521, %v230_v28  ;;  %v572_v7 = vpop.eup %571 }
 0x14d   :  { %v243_v35 = vmul.f32 %v560_v9, %v239_v29  ;;  %v237_v36 = vmul.f32 %v564_v18, %v233_v30  ;;  %v574_v11 = vpop.eup %573 }
 0x14e   :  { %v244_v37 = vmul.f32 %v562_v12, %v240_v32  ;;  %v238_v38 = vmul.f32 %v566_v22, %v234_v33 }
 0x14f   :  { %v247_v39 = vadd.f32 -0.28449672, %v243_v35  ;;  %v241_v40 = vadd.f32 1.4214138, %v237_v36 }
 0x150   :  { %v248_v41 = vadd.f32 -0.28449672, %v244_v37  ;;  %v242_v42 = vadd.f32 1.4214138, %v238_v38 }
 0x151   :  { %v251_v44 = vmul.f32 %v560_v9, %v247_v39  ;;  %v245_v46 = vmul.f32 %v564_v18, %v241_v40 }
 0x152   :  { %v252_v47 = vmul.f32 %v562_v12, %v248_v41  ;;  %v246_v48 = vmul.f32 %v566_v22, %v242_v42 }
 0x153   :  { %v255_v50 = vadd.f32 0.2548296, %v251_v44  ;;  %v249_v51 = vadd.f32 -0.28449672, %v245_v46 }
 0x154   :  { %v256_v54 = vadd.f32 0.2548296, %v252_v47  ;;  %v250_v55 = vadd.f32 -0.28449672, %v246_v48 }
 0x155   :  { %v259_v57 = vmul.f32 %v560_v9, %v255_v50  ;;  %v253_v58 = vmul.f32 %v564_v18, %v249_v51 }
 0x156   :  { %v260_v61 = vmul.f32 %v562_v12, %v256_v54  ;;  %v254_v62 = vmul.f32 %v566_v22, %v250_v55 }
 0x157   :  { %v279_v0 = vmul.f32 %v568_v59, %v259_v57  ;;  %v257_v2 = vadd.f32 0.2548296, %v253_v58 }
 0x158   :  { %v280_v3 = vmul.f32 %v570_v63, %v260_v61  ;;  %v258_v4 = vadd.f32 0.2548296, %v254_v62 }
 0x159   :  { %v283_v5 = vsub.f32 1.0, %v279_v0  ;;  %v261_v6 = vmul.f32 %v564_v18, %v257_v2 }
 0x15a   :  { %v284_v8 = vsub.f32 1.0, %v280_v3  ;;  %v262_v10 = vmul.f32 %v566_v22, %v258_v4 }
 0x15b   :  { %v287_v13 = vmul.f32 %v283_v5, %v764_v52  ;;  %v281_v14 = vmul.f32 %v572_v7, %v261_v6  ;;  %v194_v52 = vmul.f32 0.5, %v766_v53 }
 0x15c   :  { %v288_v9 = vmul.f32 %v284_v8, %v770_v56  ;;  %v282_v15 = vmul.f32 %v574_v11, %v262_v10 }
 0x15d   :  { %v291_v16 = vadd.f32 1.0, %v287_v13  ;;  %v285_v12 = vsub.f32 1.0, %v281_v14 }
 0x15e   :  { %v292_v19 = vadd.f32 1.0, %v288_v9  ;;  %v286_v20 = vsub.f32 1.0, %v282_v15 }
 0x15f   :  { %v289_v18 = vmul.f32 %v285_v12, %v774_v60  ;;  %v295_v24 = vmul.f32 %v291_v16, %v191_v21  ;;  %v446_v60 = vld [vmem:[%s810_s4] ss:$0 sm:$0xff] }
 0x160   :  { %v296_v23 = vmul.f32 %v292_v19, %v192_v17  ;;  %v290_v22 = vmul.f32 %v286_v20, %v777_v1 }
 0x161   :  { %v293_v25 = vadd.f32 1.0, %v289_v18 }
 0x162   :  { %397 = vmatprep.mubr.f32.mxu1 %v296_v23  ;;  %v294_v56 = vadd.f32 1.0, %v290_v22 }
 0x163   :  { %398 = vmatmul.mubr.f32.vlgmr.msra.gmra.mrb[0].mxu1 %v295_v24  ;;  %v297_v45 = vmul.f32 %v293_v25, %v193_v26 }
 0x164   :  { %v298_v27 = vmul.f32 %v294_v56, %v194_v52 }
 0x166   :  { %402 = vmatprep.mubr.f32.mxu1 %v298_v27 }
 0x167   :  { %403 = vmatmul.mubr.f32.gmra.mrb[2].mxu1 %v297_v45 }
 0x236   :  { %v479_v28 = vpop.f32.mrb[0].mxu1 }
 0x237   :  { %v480_v43 = vpop.f32.mrb[1].mxu1 }
 0x238   :  { %v481_v1 = vadd.f32 %v480_v43, %v479_v28 }
 0x23a   :  { %v424_v29 = vadd.f32 %v481_v1, %v446_v60  ;;  %v482_v30 = vpop.f32.mrb[2].mxu1 }
 0x23b   :  { %v483_v31 = vpop.f32.mrb[3].mxu1 }
 0x23c   :  { %426 = vst [vmem:[#allocation9] sm:$0xff] %v424_v29  ;;  %v484_v53 = vadd.f32 %v483_v31, %v482_v30 }
 0x23e   :  { %v425_v49 = vadd.f32 %v484_v53, %v446_v60 }
 0x240   :  { %427 = vst [vmem:[#allocation9 + $0x8] sm:$0xff] %v425_v49 }
 0x241   :  { %652 = shalt.err (!%p649_p0)
}
 0x242   :  { %s653_s12 = scalar_lea.hbm %s811_s5, 256 }
 0x243   :  { %p654_p1 = scmp.ne.s32.totalorder %s811_s5, %s653_s12  ;;  %p657_p2 = scmp.lt.u32.totalorder %s653_s12, %s811_s5 }
 0x245   :  { %p659_p3 = pnand %p657_p2, %p654_p1 }
 0x247   :  { %662 = shalt.err (!%p659_p3)
}
 0x248   :  { %439 = dma.vmem_to_hbm [thread:$0]  %s434_s9, 256, %s811_s5, [#allocation5], %s673_s1, %s673_s1, %s674_s17  }
 0x249   :  { %667 = dma.done.wait [#allocation5], 256  }
 0x24a   :  { %668 = vsyncadd [#allocation5], 4294967040 }
 0x24b   :  { %443 = vsyncpa [#allocation4], 1 }
 0x24c   :  { %444 = vsyncpa [#allocation7], 1 }
 0x24d   :  { %445 = vsyncpa [#allocation5], 1 }

</bundles_post_ra>
